<compile_context>
chip_gen: v7x
topology: tpu7x:2x2x1
jax: 0.10.0
libtpu: 0.0.40
codegen_flags: <defaults>
</compile_context>

<pallas_src>
import functools

import jax
import jax.numpy as jnp
from jax import lax
from jax.experimental import pallas as pl
from jax.experimental.pallas import tpu as pltpu


def _round_up(x, m):
    return (x + m - 1) // m * m


def _dilated_conv_kernel(x_ref, h_ref, w_ref, b_ref, o_ref, *,
                         kernel_size, dilation, tile_t):
    """One (batch, time-tile) grid step.

    x_ref: (C_in_pad, TILE_T)        main input tile (time on lanes)   VMEM
    h_ref: (C_in_pad, HALO_BLOCK)    right-halo columns (next tile)    VMEM
    w_ref: (K, C_out_pad, C_in_pad)  per-tap weights                   VMEM
    b_ref: (C_out_pad, 1)            bias column                       VMEM
    o_ref: (C_out_pad, TILE_T)       output tile, time on lanes
    """
    # One small halo'd window instead of a (K*C_in_pad, TILE_T) stacked temp.
    xw = jnp.concatenate([x_ref[...], h_ref[...]], axis=1)
    acc = jnp.zeros(o_ref.shape, jnp.float32)
    # K accumulated MXU dots (static unroll), f32 accumulation.
    for k in range(kernel_size):
        off = k * dilation
        acc += jnp.dot(w_ref[k], xw[:, off:off + tile_t],
                       preferred_element_type=jnp.float32)
    o_ref[...] = (acc + b_ref[...]).astype(o_ref.dtype)


def dilated_conv1d(x, weight, bias, *, kernel_size, dilation=1, groups=1,
                   tile_t=1024, compute_dtype=jnp.float32):
    """Pallas equivalent of DilatedConv.forward.

    x     : (B, C_in, T)  float32, NCW (same as PyTorch)
    weight: (C_out, C_in // groups, K)  PyTorch Conv1d weight layout
    bias  : (C_out,)
    returns (B, C_out, T): conv output with the trailing sample removed when the
    receptive field is even (exactly the PyTorch module).
    """
    B, C_in, T = x.shape
    C_out = weight.shape[0]
    K, d = kernel_size, dilation

    receptive_field = (K - 1) * d + 1
    padding = receptive_field // 2
    remove = 1 if receptive_field % 2 == 0 else 0
    t_final = T + 2 * padding - d * (K - 1) - remove          # == T

    if groups != 1:
        # TODO(synk): grouped-conv Pallas path (block-diagonal fused weight) is not
        # implemented; fall back to XLA's grouped dilated conv.
        out = lax.conv_general_dilated(
            x, weight, window_strides=(1,), padding=[(padding, padding)],
            rhs_dilation=(d,), dimension_numbers=("NCH", "OIH", "NCH"),
            feature_group_count=groups) + bias[None, :, None]
        return out[:, :, :t_final]

    # --- layout / tiling decisions -----------------------------------------
    c_in_pad = _round_up(C_in, 8)          # sublane-align contraction channels
    c_out_pad = _round_up(C_out, 8)        # sublane-align output channels
    halo = (K - 1) * d

    # tile_t: lane-dense (multiple of 128), large enough that per-step overhead
    # is amortized, but not overshooting t_final; must cover the halo.
    min_tile = max(128, _round_up(max(halo, 1), 128))
    tile_t = max(min_tile, min(_round_up(tile_t, 128), _round_up(t_final, 128)))
    if B == 1:
        # v7x has 2 TensorCores: keep nt >= 2 for single-batch calls when possible.
        half = _round_up(pl.cdiv(t_final, 2), 128)
        if half >= min_tile:
            tile_t = min(tile_t, half)
    nt = pl.cdiv(t_final, tile_t)
    # Rebalance so nt*tile_t barely overshoots t_final (less wasted output HBM).
    tile_t = max(min_tile, _round_up(pl.cdiv(t_final, nt), 128))
    nt = pl.cdiv(t_final, tile_t)
    t_out_pad = nt * tile_t

    # Halo is read from the start of the *next* tile via a second (small) BlockSpec
    # on the same input array -> no wrapper-side halo duplication.
    halo_block = 128 if halo <= 128 else tile_t
    lane_factor = tile_t // halo_block        # halo-block index multiplier
    t_in_pad = t_out_pad + halo_block

    # --- wrapper glue: zero-pad once, weight re-layout (no per-tile stacking) ---
    pad_left = padding
    pad_right = t_in_pad - padding - T        # >= 0 by construction
    x_p = jnp.pad(x, ((0, 0), (0, c_in_pad - C_in), (pad_left, pad_right)))
    x_p = x_p.astype(compute_dtype)

    # Per-tap weights: w3d[k, co, ci] = weight[co, ci, k] (zero-padded channels)
    w3d = jnp.zeros((K, c_out_pad, c_in_pad), compute_dtype)
    w3d = w3d.at[:, :C_out, :C_in].set(
        jnp.transpose(weight, (2, 0, 1)).astype(compute_dtype))
    b_col = jnp.zeros((c_out_pad, 1), jnp.float32).at[:C_out, 0].set(
        bias.astype(jnp.float32))

    kernel = functools.partial(
        _dilated_conv_kernel, kernel_size=K, dilation=d, tile_t=tile_t)

    bpe = jnp.dtype(compute_dtype).itemsize
    cost = pl.CostEstimate(
        flops=2 * B * nt * tile_t * c_in_pad * c_out_pad * K,
        transcendentals=0,
        bytes_accessed=int(x_p.size * bpe + w3d.size * bpe + b_col.size * 4
                           + B * c_out_pad * t_out_pad * 4))

    # VMEM budget: double-buffered input (main + halo) + output + weight + bias.
    vmem_need = 2 * (c_in_pad * (tile_t + halo_block) * bpe
                     + c_out_pad * tile_t * 4
                     + K * c_out_pad * c_in_pad * bpe
                     + c_out_pad * 128 * 4)
    vmem_limit = int(min(64 << 20, max(32 << 20, 2 * vmem_need)))

    out = pl.pallas_call(
        kernel,
        out_shape=jax.ShapeDtypeStruct((B, c_out_pad, t_out_pad), jnp.float32),
        grid_spec=pltpu.PrefetchScalarGridSpec(
            num_scalar_prefetch=0,
            grid=(B, nt),
            in_specs=[
                # main time tile of the padded input
                pl.BlockSpec((None, c_in_pad, tile_t),
                             lambda b, t: (b, 0, t)),
                # right-halo: first halo_block lanes of the next tile
                pl.BlockSpec((None, c_in_pad, halo_block),
                             lambda b, t: (b, 0, (t + 1) * lane_factor)),
                # per-tap weights (resident)
                pl.BlockSpec((K, c_out_pad, c_in_pad), lambda b, t: (0, 0, 0)),
                # bias column (resident)
                pl.BlockSpec((c_out_pad, 1), lambda b, t: (0, 0)),
            ],
            out_specs=pl.BlockSpec((None, c_out_pad, tile_t),
                                   lambda b, t: (b, 0, t)),
        ),
        compiler_params=pltpu.CompilerParams(
            dimension_semantics=("parallel", "parallel"),
            vmem_limit_bytes=vmem_limit,
        ),
        cost_estimate=cost,
    )(x_p, x_p, w3d, b_col)

    # Skip the trailing slice (a full extra HBM round trip) when nothing was padded.
    if c_out_pad == C_out and t_out_pad == t_final:
        return out
    return out[:, :C_out, :t_final]


def _reference_conv1d(x, weight, bias, *, kernel_size, dilation, groups=1):
    """Pure-JAX reference matching nn.Conv1d + the DilatedConv trim."""
    receptive_field = (kernel_size - 1) * dilation + 1
    padding = receptive_field // 2
    remove = 1 if receptive_field % 2 == 0 else 0
    out = lax.conv_general_dilated(
        x, weight, window_strides=(1,), padding=[(padding, padding)],
        rhs_dilation=(dilation,), dimension_numbers=("NCH", "OIH", "NCH"),
        feature_group_count=groups) + bias[None, :, None]
    if remove:
        out = out[:, :, :-remove]
    return out


if __name__ == "__main__":
    key = jax.random.PRNGKey(0)

    # Case 1: nominal small config (odd receptive field, dilation 2).
    B, C_IN, C_OUT, T, K, D = 2, 4, 8, 16, 3, 2
    k1, k2, k3, key = jax.random.split(key, 4)
    x = jax.random.normal(k1, (B, C_IN, T), dtype=jnp.float32)
    w = jax.random.normal(k2, (C_OUT, C_IN, K), dtype=jnp.float32) * 0.1
    b = jax.random.normal(k3, (C_OUT,), dtype=jnp.float32) * 0.1
    out = jax.block_until_ready(dilated_conv1d(x, w, b, kernel_size=K, dilation=D))
    ref = _reference_conv1d(x, w, b, kernel_size=K, dilation=D)
    assert out.shape == (B, C_OUT, T), out.shape
    assert jnp.allclose(out, ref, atol=1e-4, rtol=1e-4), float(jnp.max(jnp.abs(out - ref)))

    # Case 2: even receptive field (trailing-sample removal), B==1 so the wrapper
    # splits time into 2 tiles -> exercises the cross-tile halo path.
    B, C_IN, C_OUT, T, K, D = 1, 3, 5, 200, 4, 1
    k1, k2, k3, key = jax.random.split(key, 4)
    x = jax.random.normal(k1, (B, C_IN, T), dtype=jnp.float32)
    w = jax.random.normal(k2, (C_OUT, C_IN, K), dtype=jnp.float32) * 0.1
    b = jax.random.normal(k3, (C_OUT,), dtype=jnp.float32) * 0.1
    out = jax.block_until_ready(dilated_conv1d(x, w, b, kernel_size=K, dilation=D))
    ref = _reference_conv1d(x, w, b, kernel_size=K, dilation=D)
    assert out.shape == (B, C_OUT, T), out.shape
    assert jnp.allclose(out, ref, atol=1e-4, rtol=1e-4), float(jnp.max(jnp.abs(out - ref)))

    print("KERNEL_OK")
</pallas_src>

<mosaic_0001>
module attributes {stable_mosaic.version = 11 : i64} {
  func.func @_dilated_conv_kernel(%arg0: i32, %arg1: i32, %arg2: memref<1x8x128xf32, #tpu.memory_space<vmem>>, %arg3: memref<1x8x128xf32, #tpu.memory_space<vmem>>, %arg4: memref<3x8x8xf32, #tpu.memory_space<vmem>>, %arg5: memref<8x1xf32, #tpu.memory_space<vmem>>, %arg6: memref<1x8x128xf32, #tpu.memory_space<vmem>>) attributes {dimension_semantics = [#tpu.dimension_semantics<parallel>, #tpu.dimension_semantics<parallel>], iteration_bounds = array<i64: 2, 1>, scalar_prefetch = 0 : i64, scratch_operands = 0 : i64, tpu.core_type = #tpu.core_type<tc>, window_params = [{transform_indices = @transform_0, window_bounds = array<i64: 1, 8, 128>}, {transform_indices = @transform_1, window_bounds = array<i64: 1, 8, 128>}, {pipeline_mode = #tpu.pipeline_mode<synchronous>, transform_indices = @transform_2, window_bounds = array<i64: 3, 8, 8>}, {pipeline_mode = #tpu.pipeline_mode<synchronous>, transform_indices = @transform_3, window_bounds = array<i64: 8, 1>}, {transform_indices = @transform_4, window_bounds = array<i64: 1, 8, 128>}]} {
    %c0 = arith.constant 0 : index
    %c0_0 = arith.constant 0 : index
    %c0_1 = arith.constant 0 : index
    %0 = vector.load %arg2[%c0, %c0_0, %c0_1] : memref<1x8x128xf32, #tpu.memory_space<vmem>>, vector<1x8x128xf32>
    %1 = vector.shape_cast %0 : vector<1x8x128xf32> to vector<8x128xf32>
    %c0_2 = arith.constant 0 : index
    %c0_3 = arith.constant 0 : index
    %c0_4 = arith.constant 0 : index
    %2 = vector.load %arg3[%c0_2, %c0_3, %c0_4] : memref<1x8x128xf32, #tpu.memory_space<vmem>>, vector<1x8x128xf32>
    %3 = vector.shape_cast %2 : vector<1x8x128xf32> to vector<8x128xf32>
    %4 = tpu.concatenate %1, %3 in 1 : vector<8x128xf32>, vector<8x128xf32> -> vector<8x256xf32>
    %cst = arith.constant 0.000000e+00 : f32
    %5 = vector.broadcast %cst : f32 to vector<8x128xf32>
    %c0_5 = arith.constant 0 : index
    %c0_6 = arith.constant 0 : index
    %c0_7 = arith.constant 0 : index
    %6 = vector.load %arg4[%c0_5, %c0_6, %c0_7] : memref<3x8x8xf32, #tpu.memory_space<vmem>>, vector<1x8x8xf32>
    %7 = vector.shape_cast %6 : vector<1x8x8xf32> to vector<8x8xf32>
    %8 = vector.extract_strided_slice %4 {offsets = [0, 0], sizes = [8, 128], strides = [1, 1]} : vector<8x256xf32> to vector<8x128xf32>
    %cst_8 = arith.constant dense<0.000000e+00> : vector<8x128xf32>
    %9 = tpu.matmul %7, %8, %cst_8 {dimension_numbers = #tpu.dot_dimension_numbers<[1], [0], [0], [1], [0, 0, 1, 1], [], []>} : vector<8x8xf32>, vector<8x128xf32>, vector<8x128xf32> -> vector<8x128xf32>
    %10 = arith.addf %5, %9 : vector<8x128xf32>
    %c1 = arith.constant 1 : index
    %c0_9 = arith.constant 0 : index
    %c0_10 = arith.constant 0 : index
    %11 = vector.load %arg4[%c1, %c0_9, %c0_10] : memref<3x8x8xf32, #tpu.memory_space<vmem>>, vector<1x8x8xf32>
    %12 = vector.shape_cast %11 : vector<1x8x8xf32> to vector<8x8xf32>
    %13 = vector.extract_strided_slice %4 {offsets = [0, 2], sizes = [8, 128], strides = [1, 1]} : vector<8x256xf32> to vector<8x128xf32>
    %cst_11 = arith.constant dense<0.000000e+00> : vector<8x128xf32>
    %14 = tpu.matmul %12, %13, %cst_11 {dimension_numbers = #tpu.dot_dimension_numbers<[1], [0], [0], [1], [0, 0, 1, 1], [], []>} : vector<8x8xf32>, vector<8x128xf32>, vector<8x128xf32> -> vector<8x128xf32>
    %15 = arith.addf %10, %14 : vector<8x128xf32>
    %c2 = arith.constant 2 : index
    %c0_12 = arith.constant 0 : index
    %c0_13 = arith.constant 0 : index
    %16 = vector.load %arg4[%c2, %c0_12, %c0_13] : memref<3x8x8xf32, #tpu.memory_space<vmem>>, vector<1x8x8xf32>
    %17 = vector.shape_cast %16 : vector<1x8x8xf32> to vector<8x8xf32>
    %18 = vector.extract_strided_slice %4 {offsets = [0, 4], sizes = [8, 128], strides = [1, 1]} : vector<8x256xf32> to vector<8x128xf32>
    %cst_14 = arith.constant dense<0.000000e+00> : vector<8x128xf32>
    %19 = tpu.matmul %17, %18, %cst_14 {dimension_numbers = #tpu.dot_dimension_numbers<[1], [0], [0], [1], [0, 0, 1, 1], [], []>} : vector<8x8xf32>, vector<8x128xf32>, vector<8x128xf32> -> vector<8x128xf32>
    %20 = arith.addf %15, %19 : vector<8x128xf32>
    %c0_15 = arith.constant 0 : index
    %c0_16 = arith.constant 0 : index
    %21 = vector.load %arg5[%c0_15, %c0_16] : memref<8x1xf32, #tpu.memory_space<vmem>>, vector<8x1xf32>
    %22 = vector.broadcast %21 : vector<8x1xf32> to vector<8x128xf32>
    %23 = arith.addf %20, %22 : vector<8x128xf32>
    %c0_17 = arith.constant 0 : index
    %c0_18 = arith.constant 0 : index
    %c0_19 = arith.constant 0 : index
    %24 = vector.load %arg6[%c0_17, %c0_18, %c0_19] : memref<1x8x128xf32, #tpu.memory_space<vmem>>, vector<1x8x128xf32>
    %25 = vector.shape_cast %24 : vector<1x8x128xf32> to vector<8x128xf32>
    %26 = vector.shape_cast %23 : vector<8x128xf32> to vector<1x8x128xf32>
    tpu.vector_store %arg6[%c0_17, %c0_18, %c0_19], %26 {strides = array<i32>} : memref<1x8x128xf32, #tpu.memory_space<vmem>>, vector<1x8x128xf32>,
    return
  }
  func.func @transform_0(%arg0: i32, %arg1: i32) -> (i32, i32, i32) {
    %c0_i32 = arith.constant 0 : i32
    %c0_i32_0 = arith.constant 0 : i32
    return %arg0, %c0_i32, %arg1 : i32, i32, i32
  }
  func.func @transform_1(%arg0: i32, %arg1: i32) -> (i32, i32, i32) {
    %c1_i32 = arith.constant 1 : i32
    %0 = arith.addi %arg1, %c1_i32 : i32
    %c1_i32_0 = arith.constant 1 : i32
    %1 = arith.muli %0, %c1_i32_0 : i32
    %c0_i32 = arith.constant 0 : i32
    %c0_i32_1 = arith.constant 0 : i32
    return %arg0, %c0_i32, %1 : i32, i32, i32
  }
  func.func @transform_2(%arg0: i32, %arg1: i32) -> (i32, i32, i32) {
    %c0_i32 = arith.constant 0 : i32
    %c0_i32_0 = arith.constant 0 : i32
    %c0_i32_1 = arith.constant 0 : i32
    %c0_i32_2 = arith.constant 0 : i32
    return %c0_i32, %c0_i32_0, %c0_i32_1 : i32, i32, i32
  }
  func.func @transform_3(%arg0: i32, %arg1: i32) -> (i32, i32) {
    %c0_i32 = arith.constant 0 : i32
    %c0_i32_0 = arith.constant 0 : i32
    %c0_i32_1 = arith.constant 0 : i32
    return %c0_i32, %c0_i32_0 : i32, i32
  }
  func.func @transform_4(%arg0: i32, %arg1: i32) -> (i32, i32, i32) {
    %c0_i32 = arith.constant 0 : i32
    %c0_i32_0 = arith.constant 0 : i32
    return %arg0, %c0_i32, %arg1 : i32, i32, i32
  }
}

</mosaic_0001>

<bundles_post_ra>
// kernel: tpu_custom_call.1
= control target key start
LH: loop header
LB: loop body
LE: loop exit
PB: predicated region body
PF: predicated region fallthrough
CT: control target
= control target key end

     0   :  { %s1285_s0 = inlined_call_operand.hbm [shape: f32[2,8,256], index: 0, kind: input, shape index: {}]   ;;  %s1286_s1 = inlined_call_operand.hbm [shape: f32[2,8,256], index: 1, kind: input, shape index: {}]   ;;  %s1287_s2 = inlined_call_operand.hbm [shape: f32[3,8,8], index: 2, kind: input, shape index: {}]   ;;  %s1288_s3 = inlined_call_operand.vmem [shape: f32[8,1], index: 3, kind: input, shape index: {}]   ;;  %s1289_s4 = inlined_call_operand.hbm [shape: f32[2,8,128], index: 4, kind: output, shape index: {}]  }
   0x1   :  { %1296 = sst [smem:[#allocation15_spill]] %s1287_s2 }
   0x2   :  { %9 = vsyncpa [#allocation3], 0 }
   0x3   :  { %11 = vsyncpa [#allocation3 + $0x1], 0 }
   0x4   :  { %12 = vsyncpa [#allocation6], 0 }
   0x5   :  { %14 = vsyncpa [#allocation6 + $0x1], 0 }
   0x6   :  { %15 = vsyncpa [#allocation4], 0 }
   0x7   :  { %17 = vsyncpa [#allocation4 + $0x1], 0  ;;  %s1022_s15 = smov 0   ;;  %s1024_s16 = smov 0  }
   0x8   :  { %s1026_s17 = smov 0   ;;  %s1028_s18 = smov 0  }
   0x9   :  { %s1030_s19 = smov 0   ;;  %s1032_s20 = smov 0  }
   0xa LB: > { %1297 = sst [smem:[#allocation13_spill]] %s980_s19  ;;  %s1053_s21 = sadd.s32 4294967295, %s984_s20   ;;  %s984_s20 = sphi %s1032_s20, %s23_s20   ;;  %s980_s19 = sphi %s1030_s19, %s1316_s19   ;;  %s976_s18 = sphi %s1028_s18, %s1315_s18   ;;  %s972_s17 = sphi %s1026_s17, %s1319_s17   ;;  %s968_s16 = sphi %s1024_s16, %s1318_s16   ;;  %s964_s15 = sphi %s1022_s15, %s1317_s15  }
   0xb   : > { %s674_s22 = sadd.s32 4294967294, %s984_s20   ;;  %p57_p0 = scmp.ne.s32.totalorder %s968_s16, %s964_s15 }
   0xc   : > { %p1290_p1 = scmp.eq.s32.totalorder %s1053_s21, 0  ;;  %p161_p3 = scmp.eq.s32.totalorder %s674_s22, 1 }
   0xd   : > { %p675_p5 = scmp.ge.s32.totalorder %s984_s20, 1  ;;  %p168_p7 = scmp.lt.s32.totalorder %s984_s20, 3 }
   0xe   : > { %p1062_p4 = por %p1290_p1, %p57_p0  ;;  %p1067_p6 = por %p161_p3, %p57_p0 }
   0xf   : > { %p1072_p8 = pnand %p675_p5, %p168_p7  ;;  %s986_s26 = smov [#allocation7]  }
  0x10   : > { %s1298_s23 = scalar_select %p1062_p4, 1, 0 }
  0x11   : > { %s1299_s24 = scalar_select %p1067_p6, 1, 0 }
  0x12   : > { %s1300_s25 = scalar_select %p1072_p8, 1, 0 }
  0x13   : > { %s180_s27 = sshll.u32 %s986_s26, 4  ;;  %p729_p9 = pneg %p1072_p8  ;;  %s181_s27 = int_to_ptr.vmem [resolvable:$true] %s180_s27 }
  0x14   : > { %s35_s29 = sadd.s32 1, %s980_s19  ;;  %s1302_s2 = sld [smem:[#allocation15_spill]] }
  0x15   : > { %p1081_p11 = pnand %p729_p9, %p1290_p1 }
  0x17   : > { %p807_p13 = pneg %p1081_p11 }
  0x1a   : > { %s805_s6 = scalar_lea.hbm %s1302_s2, 384 }
  0x1b   : > { %p806_p12 = scmp.ne.s32.totalorder %s1302_s2, %s805_s6  ;;  %p812_p5 = scmp.lt.u32.totalorder %s805_s6, %s1302_s2 }
  0x1d   : > { %p808_p0 = pnand %p807_p13, %p806_p12 }
  0x1f   : > { %p809_p3 = pneg %p808_p0 }
  0x21   : > { %p814_p7 = pnand %p812_p5, %p809_p3 }
  0x23   : > { %817 = shalt.err (!%p814_p7)
}
  0x24   : > { %s818_s11 = scalar_lea.vmem %s181_s27, 384  ;;  %p826_p2 = scmp.lt.s32.totalorder %s181_s27, %s181_s27 }
  0x25   : > { %p819_p9 = scmp.ne.s32.totalorder %s181_s27, %s818_s11  ;;  %p827_p6 = scmp.lt.s32.totalorder %s818_s11, %s818_s11 }
  0x27   : > { %p821_p10 = pnand %p819_p9, %p807_p13  ;;  %p828_p4 = por %p827_p6, %p826_p2 }
  0x29   : > { %p822_p1 = pneg %p821_p10 }
  0x2b   : > { %p829_p8 = pnand %p828_p4, %p822_p1 }
  0x2d   : > { %832 = shalt.err (!%p829_p8)
}
  0x2e   : > { %s987_s12 = smov 128   ;;  %s988_s13 = smov 8  }
  0x2f   : > { %732 = dma.hbm_to_vmem [thread:$0]  (!%p1081_p11), %s1302_s2, 384, %s181_s27, [#allocation6], %s987_s12, %s987_s12, %s988_s13  }
  0x30   : > { %p37_p1 = scmp.ge.s32.totalorder %s35_s29, 2  ;;  %s44_s26 = sadd.s32 1, %s972_s17 }
  0x31   : > { %p51_p2 = scmp.ne.s32.totalorder %s972_s17, %s968_s16  ;;  %p52_p4 = scmp.eq.s32.totalorder %s984_s20, 0 }
  0x32   : > { %s1321_s29 = smov (%p37_p1, %s35_s29), 0  ;;  %p1305_p8 = scmp.eq.s32.totalorder %s1053_s21, 1 }
  0x33   : > { %1303 = sst [smem:[#allocation14_spill]] %s1321_s29  ;;  %p1108_p6 = por %p52_p4, %p51_p2 }
  0x34   : > { %p1114_p10 = por %p1305_p8, %p51_p2  ;;  %s39_s5 = ssub.s32 %s980_s19, %s1321_s29 }
  0x35   : > { %p745_p11 = scmp.lt.s32.totalorder %s984_s20, 2  ;;  %p42_p12 = scmp.eq.s32.totalorder %s39_s5, 0 }
  0x36   : > { %s1306_s28 = scalar_select %p1114_p10, 1, 0 }
  0x37   : > { %s197_s27 = sand.u32 1, %s972_s17   ;;  %s696_s8 = sshll.u32 %s980_s19, 8 }
  0x38   : > { %s1122_s6 = sshll.u32 %s197_s27, 3  ;;  %s1131_s11 = scalar_lea.hbm %s1285_s0, %s696_s8 }
  0x39   : > { %s1125_s7 = scalar_select %p42_p12, %s972_s17, %s44_s26  }
  0x3a   : > { %s201_s12 = scalar_lea.vmem [#allocation2], %s1122_s6  ;;  %p1138_p13 = pnand %p745_p11, %p1108_p6 }
  0x3b   : > { %s210_s13 = sshll.u32 %s201_s12, 4  ;;  %s1145_s5 = scalar_lea.hbm %s1286_s1, %s696_s8  ;;  %s1134_s13 = int_to_ptr.vmem [resolvable:$true] %s210_s13 }
  0x3c   : > { %s217_s9 = sand.u32 1, %s984_s20   ;;  %s198_s10 = scalar_lea.sflag [#allocation3], %s197_s27 }
  0x3d   : > { %s833_s2 = scalar_lea.hbm %s1131_s11, 128  ;;  %p835_p3 = pneg %p1138_p13 }
  0x3e   : > { %p834_p0 = scmp.ne.s32.totalorder %s1131_s11, %s833_s2  ;;  %s838_s29 = scalar_lea.hbm %s1285_s0, 512 }
  0x3f   : > { %p839_p9 = scmp.lt.u32.totalorder %s1131_s11, %s1285_s0  ;;  %p840_p1 = scmp.lt.u32.totalorder %s838_s29, %s833_s2 }
  0x40   : > { %p836_p5 = pnand %p835_p3, %p834_p0  ;;  %p842_p4 = scmp.lt.u32.totalorder %s833_s2, %s1131_s11 }
  0x41   : > { %p841_p2 = por %p840_p1, %p839_p9 }
  0x42   : > { %p837_p7 = pneg %p836_p5 }
  0x43   : > { %p843_p6 = por %p842_p4, %p841_p2 }
  0x45   : > { %p844_p8 = pnand %p843_p6, %p837_p7 }
  0x47   : > { %847 = shalt.err (!%p844_p8)
}
  0x48   : > { %s848_s27 = scalar_lea.vmem %s1134_s13, 128  ;;  %s989_s8 = smov [#allocation2]  }
  0x49   : > { %p849_p11 = scmp.ne.s32.totalorder %s1134_s13, %s848_s27  ;;  %s853_s26 = sshll.u32 %s989_s8, 4  ;;  %s854_s26 = int_to_ptr.vmem [resolvable:$false] %s853_s26 }
  0x4a   : > { %s855_s19 = scalar_lea.vmem %s854_s26, 256  ;;  %p856_p5 = scmp.lt.s32.totalorder %s1134_s13, %s854_s26 }
  0x4b   : > { %p851_p12 = pnand %p849_p11, %p835_p3  ;;  %p857_p9 = scmp.lt.s32.totalorder %s855_s19, %s848_s27 }
  0x4d   : > { %p852_p0 = pneg %p851_p12  ;;  %p858_p1 = por %p857_p9, %p856_p5 }
  0x4f   : > { %p859_p2 = pnand %p858_p1, %p852_p0 }
  0x51   : > { %862 = shalt.err (!%p859_p2)
}
  0x52   : > { %736 = dma.hbm_to_vmem [thread:$0]  (!%p1138_p13), %s1131_s11, 128, %s1134_s13, %s198_s10  }
  0x53   : > { %s1174_s2 = scalar_lea.hbm %s1145_s5, 128  ;;  %s221_s29 = scalar_lea.vmem [#allocation5], %s1122_s6 }
  0x54   : > { %s231_s30 = sshll.u32 %s221_s29, 4  ;;  %s218_s12 = scalar_lea.sflag [#allocation6], %s217_s9  ;;  %s232_s30 = int_to_ptr.vmem [resolvable:$true] %s231_s30 }
  0x55   : > { %s893_s22 = scalar_lea.hbm %s1145_s5, 256  ;;  %s868_s11 = scalar_lea.hbm %s1286_s1, 512 }
  0x56   : > { %p864_p7 = scmp.ne.s32.totalorder %s1174_s2, %s893_s22  ;;  %p869_p8 = scmp.lt.u32.totalorder %s1174_s2, %s1286_s1 }
  0x57   : > { %p870_p11 = scmp.lt.u32.totalorder %s868_s11, %s893_s22  ;;  %p872_p0 = scmp.lt.u32.totalorder %s893_s22, %s1174_s2 }
  0x58   : > { %p866_p4 = pnand %p864_p7, %p835_p3 }
  0x59   : > { %p871_p12 = por %p870_p11, %p869_p8 }
  0x5a   : > { %p867_p6 = pneg %p866_p4 }
  0x5b   : > { %p873_p5 = por %p872_p0, %p871_p12 }
  0x5d   : > { %p874_p9 = pnand %p873_p5, %p867_p6 }
  0x5f   : > { %877 = shalt.err (!%p874_p9)
}
  0x60   : > { %s878_s6 = scalar_lea.vmem %s232_s30, 128  ;;  %s990_s5 = smov [#allocation5]  }
  0x61   : > { %p879_p1 = scmp.ne.s32.totalorder %s232_s30, %s878_s6  ;;  %s883_s9 = sshll.u32 %s990_s5, 4  ;;  %s884_s9 = int_to_ptr.vmem [resolvable:$false] %s883_s9 }
  0x62   : > { %s885_s26 = scalar_lea.vmem %s884_s9, 256  ;;  %p886_p4 = scmp.lt.s32.totalorder %s232_s30, %s884_s9 }
  0x63   : > { %p881_p2 = pnand %p879_p1, %p835_p3  ;;  %p887_p10 = scmp.lt.s32.totalorder %s885_s26, %s878_s6 }
  0x65   : > { %p882_p7 = pneg %p881_p2  ;;  %p888_p8 = por %p887_p10, %p886_p4 }
  0x67   : > { %p889_p11 = pnand %p888_p8, %p882_p7 }
  0x69   : > { %892 = shalt.err (!%p889_p11)
}
  0x6a   : > { %739 = dma.hbm_to_vmem [thread:$0]  (!%p1138_p13), %s1174_s2, 128, %s232_s30, %s218_s12  }
  0x6b   : > { %p1308_p6 = scmp.ne.s32.totalorder %s1300_s25, 0 }
  0x6c   : > { %s1201_s19 = sand.u32 (!%p1308_p6), 1, %s968_s16   ;;  %p1309_p10 = scmp.ne.s32.totalorder (!%p1308_p6), %s1298_s23, 0 }
  0x6d   : > { %240 = sbr.rel (%p1308_p6) target bundleno = 482 (0x1e2), region = 36  ;;  %s1204_s29 = sshll.u32 (!%p1308_p6), %s1201_s19, 3 }
  0x6e   : > { %s243_s22 = scalar_lea.sflag (!%p1308_p6), [#allocation3], %s1201_s19  ;;  %s246_s27 = scalar_lea.vmem (!%p1308_p6), [#allocation2], %s1204_s29 }
  0x74   : > { %947 = dma.done.wait (%p1309_p10), %s243_s22, 128  }
  0x75   : > { %949 = vsyncadd (%p1309_p10), %s243_s22, 4294967168  ;;  %s251_s25 = sand.u32 1, %s1053_s21   ;;  %s255_s2 = scalar_lea.vmem [#allocation5], %s1204_s29 }
  0x76   : > { %s252_s14 = scalar_lea.sflag [#allocation6], %s251_s25 }
  0x77   : > { %951 = dma.done.wait (%p1309_p10), %s252_s14, 128  }
  0x78   : > { %953 = vsyncadd (%p1309_p10), %s252_s14, 4294967168  ;;  %p1310_p13 = scmp.eq.s32.totalorder %s1053_s21, 0 }
  0x7a   : > { %955 = dma.done.wait (%p1310_p13), [#allocation6], 384   ;;  %p1311_p3 = pmov %p1310_p13 }
  0x7b   : > { %v991_v0 = vmov 0.0   ;;  %vm992_vm0 = vmmov 0   ;;  %v993_v1 = vmov 0   ;;  %v290_v2 = vld [vmem:[%s246_s27] sm:$0xff]  ;;  %vm304_vm1 = vcmask 64512   ;;  %s994_s23 = smov 124  }
  0x7c   : > { %957 = vsyncadd (%p1311_p3), [#allocation6], 4294966912  ;;  %704 = vmatprep.subr.mxu0 %v991_v0  ;;  %709 = vmatprep.subr.mxu1 %v991_v0  ;;  %s995_s30 = smov 126   ;;  %v292_v3 = vld [vmem:[#allocation7] sm:$0xff]  ;;  %v291_v4 = vld [vmem:[%s255_s2] sm:$0xff]  ;;  %vm301_vm2 = vcmask 1031168  }
  0x7d   : > { %706 = vmatprep.mubr.msk.f32.mxu0 %vm992_vm0, %v991_v0  ;;  %711 = vmatprep.mubr.msk.f32.mxu1 %vm992_vm0, %v991_v0  ;;  %v534_v5 = vld [vmem:[%s1288_s3] sm:$0xff]  ;;  %vm457_vm3 = vcmask 1014784   ;;  %v294_v10 = vld [vmem:[#allocation7 + $0x8] sm:$0xff]  ;;  %v452_v13 = vld [vmem:[#allocation7 + $0x10] sm:$0xff]  ;;  %s693_s8 = sshll.u32 %s976_s18, 7  ;;  %s288_s11 = scalar_lea.vmem [#allocation8], %s1204_s29 }
  0x7e   : > { %804 = vset.pattern.permute.xlu0 %v993_v1  ;;  %453 = vrot.lane.b32.xlu1 %v290_v2, %s994_s23  ;;  %s557_s13 = sshll.u32 %s288_s11, 4  ;;  %s1236_s5 = scalar_lea.hbm %s1289_s4, %s693_s8  ;;  %s1238_s13 = int_to_ptr.vmem [resolvable:$true] %s557_s13 }
  0x7f   : > { %297 = vrot.lane.b32.xlu0 %v290_v2, %s995_s30  ;;  %710 = vmatpush3.msra.mxu1 %v290_v2  ;;  %s543_s9 = scalar_lea.sflag [#allocation4], %s1201_s19  ;;  %s894_s26 = scalar_lea.vmem %s1238_s13, 128 }
  0x80   : > { %712 = vmatmul.mubr.msk.f32.vlgmr.msra.gmra.mrb[0].mxu1 %vm304_vm1, %v292_v3  ;;  %p895_p12 = scmp.ne.s32.totalorder %s1238_s13, %s894_s26  ;;  %p1312_p0 = scmp.ne.s32.totalorder %s1306_s28, 0 }
  0x81   : > { %s996_s18 = smov [#allocation8]  }
  0x82   : > { %455 = vrot.lane.b32.xlu1 %v291_v4, %s994_s23  ;;  %p896_p5 = pnand %p895_p12, %p1312_p0  ;;  %s898_s29 = sshll.u32 %s996_s18, 4  ;;  %s899_s29 = int_to_ptr.vmem [resolvable:$false] %s898_s29 }
  0x83   : > { %299 = vrot.lane.b32.xlu0 %v291_v4, %s995_s30  ;;  %s900_s22 = scalar_lea.vmem %s899_s29, 256  ;;  %p901_p1 = scmp.lt.s32.totalorder %s1238_s13, %s899_s29 }
  0x84   : > { %p897_p9 = pneg %p896_p5  ;;  %p902_p2 = scmp.lt.s32.totalorder %s900_s22, %s894_s26 }
  0x86   : > { %p903_p7 = por %p902_p2, %p901_p1 }
  0x87   : > { %537 = vperm.xlu0 %804, %v534_v5  }
  0x88   : > { %p904_p4 = pnand %p903_p7, %p897_p9 }
  0xf0   : > { %v454_v6 = vpop.permute.xlu1 %453 }
  0xf1   : > { %v298_v7 = vpop.permute.xlu0 %297 }
  0xf4   : > { %v456_v8 = vpop.permute.xlu1 %455 }
  0xf5   : > { %v300_v9 = vpop.permute.xlu0 %299  ;;  %v458_v12 = vsel %vm457_vm3, %v454_v6, %v456_v8 }
  0xf6   : > { %v302_v11 = vsel %vm301_vm2, %v298_v7, %v300_v9 }
  0xf7   : > { %705 = vmatpush3.msra.mxu0 %v302_v11 }
  0xf8   : > { %707 = vmatmul.mubr.msk.f32.vlgmr.msra.gmra.mrb[0].mxu0 %vm304_vm1, %v294_v10  ;;  %714 = vmatprep.subr.mxu0 %v991_v0 }
  0xf9   : > { %715 = vmatpush3.msra.mxu0 %v458_v12  ;;  %716 = vmatprep.mubr.msk.f32.mxu0 %vm992_vm0, %v991_v0 }
  0xfc   : > { %717 = vmatmul.mubr.msk.f32.vlgmr.msra.gmra.mrb[2].mxu0 %vm304_vm1, %v452_v13 }
 0x106   : > { %v538_v20 = vpop.permute.xlu0 %537 }
 0x153   : > { %v447_v14 = vpop.f32.mrb[0].mxu1 }
 0x154   : > { %v713_v15 = vpop.f32.mrb[1].mxu1 }
 0x1cb   : > { %v374_v16 = vpop.f32.mrb[0].mxu0 }
 0x1cc   : > { %v708_v17 = vpop.f32.mrb[1].mxu0  ;;  %v448_v18 = vadd.f32 %v447_v14, %v374_v16 }
 0x1cf   : > { %v529_v19 = vpop.f32.mrb[2].mxu0 }
 0x1d0   : > { %v533_v21 = vadd.f32 %v529_v19, %v448_v18  ;;  %v718_v22 = vpop.f32.mrb[3].mxu0 }
 0x1d2   : > { %v540_v23 = vadd.f32 %v538_v20, %v533_v21 }
 0x1d4   : > { %541 = vst [vmem:[%s288_s11] sm:$0xff] %v540_v23 }
 0x1d5   : > { %907 = shalt.err (!%p904_p4)
}
 0x1d6   : > { %s908_s19 = scalar_lea.hbm %s1236_s5, 128  ;;  %s912_s14 = scalar_lea.hbm %s1289_s4, 256 }
 0x1d7   : > { %p909_p8 = scmp.ne.s32.totalorder %s1236_s5, %s908_s19  ;;  %p913_p10 = scmp.lt.u32.totalorder %s1236_s5, %s1289_s4 }
 0x1d8   : > { %p914_p13 = scmp.lt.u32.totalorder %s912_s14, %s908_s19  ;;  %p916_p12 = scmp.lt.u32.totalorder %s908_s19, %s1236_s5 }
 0x1d9   : > { %p910_p11 = pnand %p909_p8, %p1312_p0 }
 0x1da   : > { %p915_p3 = por %p914_p13, %p913_p10 }
 0x1db   : > { %p911_p6 = pneg %p910_p11 }
 0x1dc   : > { %p917_p5 = por %p916_p12, %p915_p3 }
 0x1de   : > { %p918_p9 = pnand %p917_p5, %p911_p6 }
 0x1e0   : > { %921 = shalt.err (!%p918_p9)
}
 0x1e1   : > { %727 = dma.vmem_to_hbm [thread:$0]  (%p1312_p0), %s1238_s13, 128, %s1236_s5, %s543_s9  }
 0x1e2 PF: > { %s569_s30 = sand.u32 1, %s964_s15   ;;  %p1313_p1 = scmp.ne.s32.totalorder %s1299_s24, 0 }
 0x1e3   : > { %p1314_p2 = scmp.ge.s32.totalorder %s984_s20, 2  ;;  %s570_s21 = scalar_lea.sflag [#allocation4], %s569_s30 }
 0x1e5   : > { %p741_p7 = pnand %p1314_p2, %p1313_p1 }
 0x1e7   : > { %959 = dma.done.wait (!%p741_p7), %s570_s21, 128  }
 0x1e8   : > { %961 = vsyncadd (!%p741_p7), %s570_s21, 4294967168  ;;  %s23_s20 = sadd.s32 1, %s984_s20   ;;  %s1315_s18 = sld [smem:[#allocation13_spill]] }
 0x1e9   : > { %p20_p4 = scmp.ge.s32.totalorder %s23_s20, 4   ;;  %s1316_s19 = sld [smem:[#allocation14_spill]] }
 0x1ea   : > { %s1317_s15 = smov %s968_s16  ;;  %s1318_s16 = smov %s972_s17 }
 0x1eb   : > { %s1319_s17 = smov %s1125_s7  ;;  %22 = sbr.rel (!%p20_p4) target bundleno = 10 (0xa), region = 100 }
 0x1f2   :  { %575 = vsyncpa [#allocation3], 1 }
 0x1f3   :  { %577 = vsyncpa [#allocation3 + $0x1], 1 }
 0x1f4   :  { %578 = vsyncpa [#allocation6], 1 }
 0x1f5   :  { %580 = vsyncpa [#allocation6 + $0x1], 1 }
 0x1f6   :  { %581 = vsyncpa [#allocation4], 1 }
 0x1f7   :  { %583 = vsyncpa [#allocation4 + $0x1], 1 }

</bundles_post_ra>
